<compile_context>
chip_gen: v7x
topology: tpu7x:2x2x1
jax: 0.10.0
libtpu: 0.0.40
codegen_flags: <defaults>
</compile_context>

<pallas_src>
import functools

import jax
import jax.numpy as jnp
from jax import lax
from jax.experimental import pallas as pl
from jax.experimental.pallas import tpu as pltpu


# ------------------------------ fused kernel -------------------------------- #

def _fused_kernel(n_enc, n_disc, N, C, *refs):
    """Entire controversialnet forward in one kernel; intermediates stay on-chip."""
    num_fixed = 10
    num_in = num_fixed + 2 * n_enc + 2 * (n_disc - 1)
    in_refs, out_refs = refs[:num_in], refs[num_in:]
    (f_ref, x_ref, pf_ref, mem_ref, oh_ref, cnt_ref,
     e_ref, p_ref, w0_ref, b0_ref) = in_refs[:num_fixed]
    enc_refs = in_refs[num_fixed:num_fixed + 2 * n_enc]
    disc_refs = in_refs[num_fixed + 2 * n_enc:]
    feat_ref, force_ref, out_ref, si_ref = out_refs

    # ---- input_ = F_ @ X ; encoder MLP (tanh on all but the last layer) -----
    h = jnp.dot(f_ref[...], x_ref[...], preferred_element_type=jnp.float32)
    for li in range(n_enc):
        w = enc_refs[2 * li][...]
        b = enc_refs[2 * li + 1][...]
        h = jnp.dot(h, w, preferred_element_type=jnp.float32) + b
        if li < n_enc - 1 or n_enc == 1:
            # a 1-layer encoder keeps its tanh, matching the PyTorch Sequential
            h = jnp.tanh(h)
    emb = h                                                        # (N, D_emb)
    feat_ref[...] = emb

    # ---- pairwise Euclidean distances via the Gram matrix (MXU) -------------
    # emb @ emb.T without materializing a transpose.
    g = lax.dot_general(emb, emb, (((1,), (1,)), ((), ())),
                        preferred_element_type=jnp.float32)        # (N, N)
    rsq = jnp.sum(emb * emb, axis=1, keepdims=True)                # (N, 1) ||e_i||^2
    row = lax.broadcasted_iota(jnp.int32, (N, N), 0)
    col = lax.broadcasted_iota(jnp.int32, (N, N), 1)
    eye = row == col
    r_row = jnp.sum(jnp.where(eye, g, 0.0), axis=0, keepdims=True)  # (1, N) diag(g)
    sq = jnp.maximum(rsq + r_row - 2.0 * g, 0.0)                    # clamp f32 rounding
    dist = jnp.where(eye, 0.0, jnp.sqrt(sq))                        # zero diag (== cdist)
    force = dist * pf_ref[...]
    force_ref[...] = force

    # ---- silhouette score from the on-chip distance matrix ------------------
    onehot = oh_ref[...]                                            # (N, K)
    counts = cnt_ref[...]                                           # (1, K) precomputed
    sums = jnp.dot(dist, onehot, preferred_element_type=jnp.float32)    # (N, K)
    own_sum = jnp.sum(sums * onehot, axis=1, keepdims=True)         # (N, 1)
    own_cnt = jnp.sum(onehot * counts, axis=1, keepdims=True)       # (N, 1)
    a = own_sum / jnp.maximum(own_cnt - 1.0, 1.0)
    big = jnp.float32(1e30)                                         # finite sentinel
    mean_other = sums / jnp.maximum(counts, 1.0)
    mean_other = jnp.where((onehot > 0) | (counts < 0.5), big, mean_other)
    b_ = jnp.min(mean_other, axis=1, keepdims=True)                 # (N, 1)
    s = (b_ - a) / jnp.maximum(jnp.maximum(a, b_), 1e-12)
    s = jnp.where(own_cnt > 1.0, s, 0.0)
    si_ref[...] = jnp.sum(s, axis=0, keepdims=True) * (1.0 / N)     # (1, 1)

    # ---- Fg = new_force @ members; row-major flatten folded into disc layer 0
    fg = jnp.dot(force, mem_ref[...], preferred_element_type=jnp.float32)  # (N, C)
    # vec_rowmajor(fg) @ W0  computed without any in-kernel reshape:
    #   fgx[i, c*H + h]  = fg[i, c]                       (fg @ E)
    #   prod[i, c*H + h] = fg[i, c] * W0[i*C + c, h]      (fgx * W0_rowflat)
    #   z[h]             = sum_{i,c} prod[i, c*H + h]     (row-sum, then @ P)
    fgx = jnp.dot(fg, e_ref[...], preferred_element_type=jnp.float32)       # (N, C*H0)
    prod = fgx * w0_ref[...]                                                # (N, C*H0)
    zflat = jnp.sum(prod, axis=0, keepdims=True)                            # (1, C*H0)
    z = jnp.dot(zflat, p_ref[...], preferred_element_type=jnp.float32) + b0_ref[...]
    z = jnp.maximum(z, 0.0)                                                 # ReLU (layer 0)

    for li in range(1, n_disc):
        w = disc_refs[2 * (li - 1)][...]
        b = disc_refs[2 * (li - 1) + 1][...]
        z = jnp.dot(z, w, preferred_element_type=jnp.float32) + b
        if li < n_disc - 1:
            z = jnp.maximum(z, 0.0)                                         # ReLU

    # ---- final Softmax over the last axis (exact division) ------------------
    if n_disc > 1:
        m = jnp.max(z, axis=-1, keepdims=True)
        e = jnp.exp(z - m)
        z = e / jnp.sum(e, axis=-1, keepdims=True)
    out_ref[...] = z


# ------------------------------- forward wrapper ----------------------------- #

def controversialnet_forward(params, F_, X, path_forces, members, labels,
                             num_clusters):
    N = F_.shape[0]
    C = members.shape[1]
    enc = params["encoder"]
    disc = params["disc"]
    n_enc = len(enc)
    n_disc = len(disc)
    emb_dim = enc[-1][0].shape[1]
    h0 = disc[0][0].shape[1]
    out_dim = disc[-1][0].shape[1]

    # TODO(synk): original get_silhouette2 parses labels out of a pandas DataFrame
    # and calls sklearn.silhouette_score on detached numpy; here labels are given
    # directly and the score is computed in-kernel from the distance matrix.
    onehot = jax.nn.one_hot(labels, num_clusters, dtype=jnp.float32)
    counts = jnp.sum(onehot, axis=0, keepdims=True)                 # (1, K), hoisted

    # Discriminator layer-0 weight pre-arranged for the reshape-free contraction.
    w0, b0 = disc[0]
    w0_flat = w0.reshape(N, C * h0)        # (N*C, H0) row-major == (N, C*H0)
    # E[c', c*H0 + h] = (c' == c):  (fg @ E)[i, c*H0+h] = fg[i, c]
    e_mat = (jnp.arange(C * h0)[None, :] // h0
             == jnp.arange(C)[:, None]).astype(jnp.float32)         # (C, C*H0)
    # P[c*H0 + h', h] = (h' == h):  regroups the flattened lanes back to H0.
    p_mat = (jnp.arange(C * h0)[:, None] % h0
             == jnp.arange(h0)[None, :]).astype(jnp.float32)        # (C*H0, H0)

    inputs = [F_, X, path_forces, members, onehot, counts,
              e_mat, p_mat, w0_flat, b0.reshape(1, -1)]
    for w, b in enc:
        inputs += [w, b.reshape(1, -1)]
    for w, b in disc[1:]:
        inputs += [w, b.reshape(1, -1)]      # last disc bias is zeros (bias=False)

    vmem = pl.BlockSpec(memory_space=pltpu.MemorySpace.VMEM)
    return pl.pallas_call(
        functools.partial(_fused_kernel, n_enc, n_disc, N, C),
        out_shape=(jax.ShapeDtypeStruct((N, emb_dim), jnp.float32),   # new_features
                   jax.ShapeDtypeStruct((N, N), jnp.float32),         # new_force
                   jax.ShapeDtypeStruct((1, out_dim), jnp.float32),   # softmax output
                   jax.ShapeDtypeStruct((1, 1), jnp.float32)),        # silhouette
        in_specs=[vmem] * len(inputs),
        out_specs=(vmem, vmem, vmem, vmem),
    )(*inputs)


# ------------------------------ parameter init ------------------------------- #

def init_linear(key, fan_in, fan_out, bias=True):
    kw, kb = jax.random.split(key)
    bound = 1.0 / jnp.sqrt(jnp.float32(fan_in))
    w = jax.random.uniform(kw, (fan_in, fan_out), jnp.float32, -bound, bound)
    if bias:
        b = jax.random.uniform(kb, (fan_out,), jnp.float32, -bound, bound)
    else:
        b = jnp.zeros((fan_out,), jnp.float32)
    return w, b


# ----------------------------------- main ------------------------------------ #

if __name__ == "__main__":
    key = jax.random.PRNGKey(0)
    keys = jax.random.split(key, 8)

    # small shapes consistent with the module
    N = 8                          # number of nodes
    M_in = 8                       # inner dim of F_ @ X
    in_feats1 = 16
    hidden_feats1 = [32, 8]        # encoder widths (embedding dim = 8)
    C = 4                          # number of communities (columns of `members`)
    in_feats2 = N * C              # Fg.reshape(1, -1) width
    hidden_feats2 = [16, 4]        # discriminator widths
    num_clusters = 2

    F_ = jax.random.normal(keys[0], (N, M_in), jnp.float32)
    X = jax.random.normal(keys[1], (M_in, in_feats1), jnp.float32)
    path_forces = jax.random.uniform(keys[2], (N, N), jnp.float32)
    members = (jax.random.uniform(keys[3], (N, C)) > 0.5).astype(jnp.float32)
    labels = jnp.array([0, 0, 0, 1, 1, 1, 0, 1], jnp.int32)   # cluster labels

    # deterministic parameter init (PyTorch Linear default-style uniform)
    enc_dims = [in_feats1] + hidden_feats1
    disc_dims = [in_feats2] + hidden_feats2
    enc_keys = jax.random.split(keys[4], len(hidden_feats1))
    disc_keys = jax.random.split(keys[5], len(hidden_feats2))
    params = {
        "encoder": [init_linear(enc_keys[i], enc_dims[i], enc_dims[i + 1], bias=True)
                    for i in range(len(hidden_feats1))],
        "disc": [init_linear(disc_keys[i], disc_dims[i], disc_dims[i + 1],
                             bias=(i < len(hidden_feats2) - 1))
                 for i in range(len(hidden_feats2))],
    }

    forward = jax.jit(controversialnet_forward, static_argnames=("num_clusters",))
    outs = forward(params, F_, X, path_forces, members, labels,
                   num_clusters=num_clusters)
    jax.block_until_ready(outs)

    new_features, new_force, output, si = outs
    assert new_features.shape == (N, hidden_feats1[-1])
    assert new_force.shape == (N, N)
    assert output.shape == (1, hidden_feats2[-1])
    assert si.shape == (1, 1)
    assert bool(jnp.all(jnp.isfinite(new_force)))
    assert bool(jnp.all(jnp.isfinite(output)))
    assert bool(jnp.all(jnp.isfinite(si)))
    assert abs(float(jnp.sum(output)) - 1.0) < 1e-4
    print("KERNEL_OK")
</pallas_src>

<mosaic_0001>
module attributes {stable_mosaic.version = 11 : i64} {
  func.func @_fused_kernel(%arg0: memref<8x8xf32, #tpu.memory_space<vmem>>, %arg1: memref<8x16xf32, #tpu.memory_space<vmem>>, %arg2: memref<8x8xf32, #tpu.memory_space<vmem>>, %arg3: memref<8x4xf32, #tpu.memory_space<vmem>>, %arg4: memref<8x2xf32, #tpu.memory_space<vmem>>, %arg5: memref<1x2xf32, #tpu.memory_space<vmem>>, %arg6: memref<4x64xf32, #tpu.memory_space<vmem>>, %arg7: memref<64x16xf32, #tpu.memory_space<vmem>>, %arg8: memref<8x64xf32, #tpu.memory_space<vmem>>, %arg9: memref<1x16xf32, #tpu.memory_space<vmem>>, %arg10: memref<16x32xf32, #tpu.memory_space<vmem>>, %arg11: memref<1x32xf32, #tpu.memory_space<vmem>>, %arg12: memref<32x8xf32, #tpu.memory_space<vmem>>, %arg13: memref<1x8xf32, #tpu.memory_space<vmem>>, %arg14: memref<16x4xf32, #tpu.memory_space<vmem>>, %arg15: memref<1x4xf32, #tpu.memory_space<vmem>>, %arg16: memref<8x8xf32, #tpu.memory_space<vmem>>, %arg17: memref<8x8xf32, #tpu.memory_space<vmem>>, %arg18: memref<1x4xf32, #tpu.memory_space<vmem>>, %arg19: memref<1x1xf32, #tpu.memory_space<vmem>>) attributes {dimension_semantics = [], scalar_prefetch = 0 : i64, scratch_operands = 0 : i64, tpu.core_type = #tpu.core_type<tc>} {
    %c0 = arith.constant 0 : index
    %c0_0 = arith.constant 0 : index
    %0 = vector.load %arg0[%c0, %c0_0] : memref<8x8xf32, #tpu.memory_space<vmem>>, vector<8x8xf32>
    %c0_1 = arith.constant 0 : index
    %c0_2 = arith.constant 0 : index
    %1 = vector.load %arg1[%c0_1, %c0_2] : memref<8x16xf32, #tpu.memory_space<vmem>>, vector<8x16xf32>
    %cst = arith.constant dense<0.000000e+00> : vector<8x16xf32>
    %2 = tpu.matmul %0, %1, %cst {dimension_numbers = #tpu.dot_dimension_numbers<[1], [0], [0], [1], [0, 0, 1, 1], [], []>} : vector<8x8xf32>, vector<8x16xf32>, vector<8x16xf32> -> vector<8x16xf32>
    %c0_3 = arith.constant 0 : index
    %c0_4 = arith.constant 0 : index
    %3 = vector.load %arg10[%c0_3, %c0_4] : memref<16x32xf32, #tpu.memory_space<vmem>>, vector<16x32xf32>
    %c0_5 = arith.constant 0 : index
    %c0_6 = arith.constant 0 : index
    %4 = vector.load %arg11[%c0_5, %c0_6] : memref<1x32xf32, #tpu.memory_space<vmem>>, vector<1x32xf32>
    %cst_7 = arith.constant dense<0.000000e+00> : vector<8x32xf32>
    %5 = tpu.matmul %2, %3, %cst_7 {dimension_numbers = #tpu.dot_dimension_numbers<[1], [0], [0], [1], [0, 0, 1, 1], [], []>} : vector<8x16xf32>, vector<16x32xf32>, vector<8x32xf32> -> vector<8x32xf32>
    %6 = vector.broadcast %4 : vector<1x32xf32> to vector<8x32xf32>
    %7 = arith.addf %5, %6 : vector<8x32xf32>
    %8 = math.tanh %7 : vector<8x32xf32>
    %c0_8 = arith.constant 0 : index
    %c0_9 = arith.constant 0 : index
    %9 = vector.load %arg12[%c0_8, %c0_9] : memref<32x8xf32, #tpu.memory_space<vmem>>, vector<32x8xf32>
    %c0_10 = arith.constant 0 : index
    %c0_11 = arith.constant 0 : index
    %10 = vector.load %arg13[%c0_10, %c0_11] : memref<1x8xf32, #tpu.memory_space<vmem>>, vector<1x8xf32>
    %cst_12 = arith.constant dense<0.000000e+00> : vector<8x8xf32>
    %11 = tpu.matmul %8, %9, %cst_12 {dimension_numbers = #tpu.dot_dimension_numbers<[1], [0], [0], [1], [0, 0, 1, 1], [], []>} : vector<8x32xf32>, vector<32x8xf32>, vector<8x8xf32> -> vector<8x8xf32>
    %12 = vector.broadcast %10 : vector<1x8xf32> to vector<8x8xf32>
    %13 = arith.addf %11, %12 : vector<8x8xf32>
    %c0_13 = arith.constant 0 : index
    %c0_14 = arith.constant 0 : index
    %14 = vector.load %arg16[%c0_13, %c0_14] : memref<8x8xf32, #tpu.memory_space<vmem>>, vector<8x8xf32>
    tpu.vector_store %arg16[%c0_13, %c0_14], %13 {strides = array<i32>} : memref<8x8xf32, #tpu.memory_space<vmem>>, vector<8x8xf32>,
    %cst_15 = arith.constant dense<0.000000e+00> : vector<8x8xf32>
    %15 = tpu.matmul %13, %13, %cst_15 {dimension_numbers = #tpu.dot_dimension_numbers<[1], [1], [0], [0], [0, 0, 1, 0], [], []>} : vector<8x8xf32>, vector<8x8xf32>, vector<8x8xf32> -> vector<8x8xf32>
    %16 = arith.mulf %13, %13 : vector<8x8xf32>
    %cst_16 = arith.constant dense<0.000000e+00> : vector<8xf32>
    %17 = vector.multi_reduction <add>, %16, %cst_16 [1] : vector<8x8xf32> to vector<8xf32>
    %18 = vector.shape_cast %17 : vector<8xf32> to vector<8x1xf32>
    %19 = tpu.iota {dimensions = array<i32: 0>} : vector<8x8xi32>
    %20 = tpu.iota {dimensions = array<i32: 1>} : vector<8x8xi32>
    %21 = arith.cmpi eq, %19, %20 : vector<8x8xi32>
    %cst_17 = arith.constant 0.000000e+00 : f32
    %22 = vector.broadcast %cst_17 : f32 to vector<8x8xf32>
    %23 = arith.select %21, %15, %22 : vector<8x8xi1>, vector<8x8xf32>
    %cst_18 = arith.constant dense<0.000000e+00> : vector<8xf32>
    %24 = vector.multi_reduction <add>, %23, %cst_18 [0] : vector<8x8xf32> to vector<8xf32>
    %25 = vector.shape_cast %24 : vector<8xf32> to vector<1x8xf32>
    %26 = vector.broadcast %18 : vector<8x1xf32> to vector<8x8xf32>
    %27 = vector.broadcast %25 : vector<1x8xf32> to vector<8x8xf32>
    %28 = arith.addf %26, %27 : vector<8x8xf32>
    %cst_19 = arith.constant 2.000000e+00 : f32
    %29 = vector.broadcast %cst_19 : f32 to vector<8x8xf32>
    %30 = arith.mulf %29, %15 : vector<8x8xf32>
    %31 = arith.subf %28, %30 : vector<8x8xf32>
    %cst_20 = arith.constant 0.000000e+00 : f32
    %32 = vector.broadcast %cst_20 : f32 to vector<8x8xf32>
    %33 = arith.maximumf %31, %32 : vector<8x8xf32>
    %34 = math.sqrt %33 : vector<8x8xf32>
    %cst_21 = arith.constant 0.000000e+00 : f32
    %35 = vector.broadcast %cst_21 : f32 to vector<8x8xf32>
    %36 = arith.select %21, %35, %34 : vector<8x8xi1>, vector<8x8xf32>
    %c0_22 = arith.constant 0 : index
    %c0_23 = arith.constant 0 : index
    %37 = vector.load %arg2[%c0_22, %c0_23] : memref<8x8xf32, #tpu.memory_space<vmem>>, vector<8x8xf32>
    %38 = arith.mulf %36, %37 : vector<8x8xf32>
    %c0_24 = arith.constant 0 : index
    %c0_25 = arith.constant 0 : index
    %39 = vector.load %arg17[%c0_24, %c0_25] : memref<8x8xf32, #tpu.memory_space<vmem>>, vector<8x8xf32>
    tpu.vector_store %arg17[%c0_24, %c0_25], %38 {strides = array<i32>} : memref<8x8xf32, #tpu.memory_space<vmem>>, vector<8x8xf32>,
    %c0_26 = arith.constant 0 : index
    %c0_27 = arith.constant 0 : index
    %40 = vector.load %arg4[%c0_26, %c0_27] : memref<8x2xf32, #tpu.memory_space<vmem>>, vector<8x2xf32>
    %c0_28 = arith.constant 0 : index
    %c0_29 = arith.constant 0 : index
    %41 = vector.load %arg5[%c0_28, %c0_29] : memref<1x2xf32, #tpu.memory_space<vmem>>, vector<1x2xf32>
    %cst_30 = arith.constant dense<0.000000e+00> : vector<8x2xf32>
    %42 = tpu.matmul %36, %40, %cst_30 {dimension_numbers = #tpu.dot_dimension_numbers<[1], [0], [0], [1], [0, 0, 1, 1], [], []>} : vector<8x8xf32>, vector<8x2xf32>, vector<8x2xf32> -> vector<8x2xf32>
    %43 = arith.mulf %42, %40 : vector<8x2xf32>
    %cst_31 = arith.constant dense<0.000000e+00> : vector<8xf32>
    %44 = vector.multi_reduction <add>, %43, %cst_31 [1] : vector<8x2xf32> to vector<8xf32>
    %45 = vector.shape_cast %44 : vector<8xf32> to vector<8x1xf32>
    %46 = vector.broadcast %41 : vector<1x2xf32> to vector<8x2xf32>
    %47 = arith.mulf %40, %46 : vector<8x2xf32>
    %cst_32 = arith.constant dense<0.000000e+00> : vector<8xf32>
    %48 = vector.multi_reduction <add>, %47, %cst_32 [1] : vector<8x2xf32> to vector<8xf32>
    %49 = vector.shape_cast %48 : vector<8xf32> to vector<8x1xf32>
    %cst_33 = arith.constant 1.000000e+00 : f32
    %50 = vector.broadcast %cst_33 : f32 to vector<8x1xf32>
    %51 = arith.subf %49, %50 : vector<8x1xf32>
    %cst_34 = arith.constant 1.000000e+00 : f32
    %52 = vector.broadcast %cst_34 : f32 to vector<8x1xf32>
    %53 = arith.maximumf %51, %52 : vector<8x1xf32>
    %54 = arith.divf %45, %53 : vector<8x1xf32>
    %cst_35 = arith.constant 1.000000e+00 : f32
    %55 = vector.broadcast %cst_35 : f32 to vector<1x2xf32>
    %56 = arith.maximumf %41, %55 : vector<1x2xf32>
    %57 = vector.broadcast %56 : vector<1x2xf32> to vector<8x2xf32>
    %58 = arith.divf %42, %57 : vector<8x2xf32>
    %cst_36 = arith.constant 0.000000e+00 : f32
    %59 = vector.broadcast %cst_36 : f32 to vector<8x2xf32>
    %60 = arith.cmpf ogt, %40, %59 : vector<8x2xf32>
    %cst_37 = arith.constant 5.000000e-01 : f32
    %61 = vector.broadcast %cst_37 : f32 to vector<1x2xf32>
    %62 = arith.cmpf olt, %41, %61 : vector<1x2xf32>
    %63 = vector.broadcast %62 : vector<1x2xi1> to vector<8x2xi1>
    %64 = arith.ori %60, %63 : vector<8x2xi1>
    %cst_38 = arith.constant 1.000000e+30 : f32
    %65 = vector.broadcast %cst_38 : f32 to vector<8x2xf32>
    %66 = arith.select %64, %65, %58 : vector<8x2xi1>, vector<8x2xf32>
    %cst_39 = arith.constant dense<0x7F800000> : vector<8xf32>
    %67 = vector.multi_reduction <minimumf>, %66, %cst_39 [1] : vector<8x2xf32> to vector<8xf32>
    %68 = vector.shape_cast %67 : vector<8xf32> to vector<8x1xf32>
    %69 = arith.subf %68, %54 : vector<8x1xf32>
    %70 = arith.maximumf %54, %68 : vector<8x1xf32>
    %cst_40 = arith.constant 9.99999996E-13 : f32
    %71 = vector.broadcast %cst_40 : f32 to vector<8x1xf32>
    %72 = arith.maximumf %70, %71 : vector<8x1xf32>
    %73 = arith.divf %69, %72 : vector<8x1xf32>
    %cst_41 = arith.constant 1.000000e+00 : f32
    %74 = vector.broadcast %cst_41 : f32 to vector<8x1xf32>
    %75 = arith.cmpf ogt, %49, %74 : vector<8x1xf32>
    %cst_42 = arith.constant 0.000000e+00 : f32
    %76 = vector.broadcast %cst_42 : f32 to vector<8x1xf32>
    %77 = arith.select %75, %73, %76 : vector<8x1xi1>, vector<8x1xf32>
    %cst_43 = arith.constant dense<0.000000e+00> : vector<1xf32>
    %78 = vector.multi_reduction <add>, %77, %cst_43 [0] : vector<8x1xf32> to vector<1xf32>
    %79 = vector.shape_cast %78 : vector<1xf32> to vector<1x1xf32>
    %cst_44 = arith.constant 1.250000e-01 : f32
    %80 = vector.broadcast %cst_44 : f32 to vector<1x1xf32>
    %81 = arith.mulf %79, %80 : vector<1x1xf32>
    %c0_45 = arith.constant 0 : index
    %c0_46 = arith.constant 0 : index
    %82 = vector.load %arg19[%c0_45, %c0_46] : memref<1x1xf32, #tpu.memory_space<vmem>>, vector<1x1xf32>
    tpu.vector_store %arg19[%c0_45, %c0_46], %81 {strides = array<i32>} : memref<1x1xf32, #tpu.memory_space<vmem>>, vector<1x1xf32>,
    %c0_47 = arith.constant 0 : index
    %c0_48 = arith.constant 0 : index
    %83 = vector.load %arg3[%c0_47, %c0_48] : memref<8x4xf32, #tpu.memory_space<vmem>>, vector<8x4xf32>
    %cst_49 = arith.constant dense<0.000000e+00> : vector<8x4xf32>
    %84 = tpu.matmul %38, %83, %cst_49 {dimension_numbers = #tpu.dot_dimension_numbers<[1], [0], [0], [1], [0, 0, 1, 1], [], []>} : vector<8x8xf32>, vector<8x4xf32>, vector<8x4xf32> -> vector<8x4xf32>
    %c0_50 = arith.constant 0 : index
    %c0_51 = arith.constant 0 : index
    %85 = vector.load %arg6[%c0_50, %c0_51] : memref<4x64xf32, #tpu.memory_space<vmem>>, vector<4x64xf32>
    %cst_52 = arith.constant dense<0.000000e+00> : vector<8x64xf32>
    %86 = tpu.matmul %84, %85, %cst_52 {dimension_numbers = #tpu.dot_dimension_numbers<[1], [0], [0], [1], [0, 0, 1, 1], [], []>} : vector<8x4xf32>, vector<4x64xf32>, vector<8x64xf32> -> vector<8x64xf32>
    %c0_53 = arith.constant 0 : index
    %c0_54 = arith.constant 0 : index
    %87 = vector.load %arg8[%c0_53, %c0_54] : memref<8x64xf32, #tpu.memory_space<vmem>>, vector<8x64xf32>
    %88 = arith.mulf %86, %87 : vector<8x64xf32>
    %cst_55 = arith.constant dense<0.000000e+00> : vector<64xf32>
    %89 = vector.multi_reduction <add>, %88, %cst_55 [0] : vector<8x64xf32> to vector<64xf32>
    %90 = vector.shape_cast %89 : vector<64xf32> to vector<1x64xf32>
    %c0_56 = arith.constant 0 : index
    %c0_57 = arith.constant 0 : index
    %91 = vector.load %arg7[%c0_56, %c0_57] : memref<64x16xf32, #tpu.memory_space<vmem>>, vector<64x16xf32>
    %cst_58 = arith.constant dense<0.000000e+00> : vector<1x16xf32>
    %92 = tpu.matmul %90, %91, %cst_58 {dimension_numbers = #tpu.dot_dimension_numbers<[1], [0], [0], [1], [0, 0, 1, 1], [], []>} : vector<1x64xf32>, vector<64x16xf32>, vector<1x16xf32> -> vector<1x16xf32>
    %c0_59 = arith.constant 0 : index
    %c0_60 = arith.constant 0 : index
    %93 = vector.load %arg9[%c0_59, %c0_60] : memref<1x16xf32, #tpu.memory_space<vmem>>, vector<1x16xf32>
    %94 = arith.addf %92, %93 : vector<1x16xf32>
    %cst_61 = arith.constant 0.000000e+00 : f32
    %95 = vector.broadcast %cst_61 : f32 to vector<1x16xf32>
    %96 = arith.maximumf %94, %95 : vector<1x16xf32>
    %c0_62 = arith.constant 0 : index
    %c0_63 = arith.constant 0 : index
    %97 = vector.load %arg14[%c0_62, %c0_63] : memref<16x4xf32, #tpu.memory_space<vmem>>, vector<16x4xf32>
    %c0_64 = arith.constant 0 : index
    %c0_65 = arith.constant 0 : index
    %98 = vector.load %arg15[%c0_64, %c0_65] : memref<1x4xf32, #tpu.memory_space<vmem>>, vector<1x4xf32>
    %cst_66 = arith.constant dense<0.000000e+00> : vector<1x4xf32>
    %99 = tpu.matmul %96, %97, %cst_66 {dimension_numbers = #tpu.dot_dimension_numbers<[1], [0], [0], [1], [0, 0, 1, 1], [], []>} : vector<1x16xf32>, vector<16x4xf32>, vector<1x4xf32> -> vector<1x4xf32>
    %100 = arith.addf %99, %98 : vector<1x4xf32>
    %cst_67 = arith.constant dense<0xFF800000> : vector<1xf32>
    %101 = vector.multi_reduction <maximumf>, %100, %cst_67 [1] : vector<1x4xf32> to vector<1xf32>
    %102 = vector.shape_cast %101 : vector<1xf32> to vector<1x1xf32>
    %103 = vector.broadcast %102 : vector<1x1xf32> to vector<1x4xf32>
    %104 = arith.subf %100, %103 : vector<1x4xf32>
    %105 = math.exp %104 : vector<1x4xf32>
    %cst_68 = arith.constant dense<0.000000e+00> : vector<1xf32>
    %106 = vector.multi_reduction <add>, %105, %cst_68 [1] : vector<1x4xf32> to vector<1xf32>
    %107 = vector.shape_cast %106 : vector<1xf32> to vector<1x1xf32>
    %108 = vector.broadcast %107 : vector<1x1xf32> to vector<1x4xf32>
    %109 = arith.divf %105, %108 : vector<1x4xf32>
    %c0_69 = arith.constant 0 : index
    %c0_70 = arith.constant 0 : index
    %110 = vector.load %arg18[%c0_69, %c0_70] : memref<1x4xf32, #tpu.memory_space<vmem>>, vector<1x4xf32>
    tpu.vector_store %arg18[%c0_69, %c0_70], %109 {strides = array<i32>} : memref<1x4xf32, #tpu.memory_space<vmem>>, vector<1x4xf32>,
    return
  }
}

</mosaic_0001>

<bundles_post_ra>
// kernel: controversialnet_forward.1
= control target key start
LH: loop header
LB: loop body
LE: loop exit
PB: predicated region body
PF: predicated region fallthrough
CT: control target
= control target key end

     0   :  { %s1500_s0 = inlined_call_operand.vmem [shape: f32[8,8], index: 0, kind: input, shape index: {}]   ;;  %s1501_s1 = inlined_call_operand.vmem [shape: f32[8,16], index: 1, kind: input, shape index: {}]   ;;  %s1502_s2 = inlined_call_operand.vmem [shape: f32[8,8], index: 2, kind: input, shape index: {}]   ;;  %s1503_s3 = inlined_call_operand.vmem [shape: f32[8,4], index: 3, kind: input, shape index: {}]   ;;  %s1504_s4 = inlined_call_operand.vmem [shape: f32[8,2], index: 4, kind: input, shape index: {}]   ;;  %s1505_s5 = inlined_call_operand.vmem [shape: f32[1,2], index: 5, kind: input, shape index: {}]   ;;  %s1506_s6 = inlined_call_operand.vmem [shape: f32[4,64], index: 6, kind: input, shape index: {}]   ;;  %s1507_s7 = inlined_call_operand.vmem [shape: f32[64,16], index: 7, kind: input, shape index: {}]   ;;  %s1508_s8 = inlined_call_operand.vmem [shape: f32[8,64], index: 8, kind: input, shape index: {}]   ;;  %s1509_s9 = inlined_call_operand.vmem [shape: f32[1,16], index: 9, kind: input, shape index: {}]   ;;  %s1510_s10 = inlined_call_operand.vmem [shape: f32[16,32], index: 10, kind: input, shape index: {}]   ;;  %s1511_s11 = inlined_call_operand.vmem [shape: f32[1,32], index: 11, kind: input, shape index: {}]   ;;  %s1512_s12 = inlined_call_operand.vmem [shape: f32[32,8], index: 12, kind: input, shape index: {}]   ;;  %s1513_s13 = inlined_call_operand.vmem [shape: f32[1,8], index: 13, kind: input, shape index: {}]   ;;  %s1514_s14 = inlined_call_operand.vmem [shape: f32[16,4], index: 14, kind: input, shape index: {}]   ;;  %s1515_s15 = inlined_call_operand.vmem [shape: f32[1,4], index: 15, kind: input, shape index: {}]   ;;  %s1516_s16 = inlined_call_operand.hbm [shape: f32[8,8], index: 16, kind: output, shape index: {0}]   ;;  %s1517_s17 = inlined_call_operand.hbm [shape: f32[8,8], index: 17, kind: output, shape index: {1}]   ;;  %s1518_s18 = inlined_call_operand.hbm [shape: f32[1,4], index: 18, kind: output, shape index: {2}]   ;;  %s1519_s19 = inlined_call_operand.hbm [shape: f32[1,1], index: 19, kind: output, shape index: {3}]  }
   0x1   :  { %1520 = sst [smem:[#allocation12_spill]] %s1500_s0 }
   0x2   :  { %1521 = sst [smem:[#allocation13_spill]] %s1501_s1 }
   0x3   :  { %1522 = sst [smem:[#allocation14_spill]] %s1502_s2 }
   0x4   :  { %1523 = sst [smem:[#allocation15_spill]] %s1503_s3 }
   0x5   :  { %25 = vsyncpa [#allocation3], 0 }
   0x6   :  { %26 = vsyncpa [#allocation5], 0  ;;  %s1524_s20 = sld [smem:[#allocation13_spill]]  ;;  %s1525_s22 = sld [smem:[#allocation12_spill]]  ;;  %vm62_vm0 = vcmask 64512   ;;  %v1186_v2 = vmov 0.0  }
   0x7   :  { %977 = vmatprep.subr.mxu0 %v1186_v2  ;;  %vm1187_vm1 = vmmov 0   ;;  %v136_v3 = vld [vmem:[%s1510_s10] sm:$0xff]  ;;  %v137_v4 = vld [vmem:[%s1510_s10 + $0x8] sm:$0xff] }
   0x8   :  { %979 = vmatprep.mubr.msk.f32.mxu0 %vm1187_vm1, %v1186_v2 }
   0xc   :  { %v61_v0 = vld [vmem:[%s1524_s20] sm:$0xff] }
   0xd   :  { %v60_v1 = vld [vmem:[%s1525_s22] sm:$0xff] }
   0xe   :  { %27 = vsyncpa [#allocation8], 0  ;;  %978 = vmatpush3.msra.mxu0 %v61_v0  ;;  %v1188_v5 = vmov 0.0|0.0   ;;  %v1047_v6 = vpack.c.bf16 %v137_v4, %v136_v3  ;;  %986 = vmatprep.mubr.msk.f32.mxu1 %vm1187_vm1, %v1186_v2  ;;  %vm145_vm2 = vcmask 130048   ;;  %v220_v9 = vld [vmem:[%s1512_s12] sm:$0xff]  ;;  %v221_v10 = vld [vmem:[%s1512_s12 + $0x8] sm:$0xff]  ;;  %v383_v26 = vlaneseq }
   0xf   :  { %1046 = vmatprep.subr.bf16.mxu1 %v1188_v5  ;;  %980 = vmatmul.mubr.msk.f32.vlgmr.msra.gmra.mrb[0].mxu0 %vm62_vm0, %v60_v1  ;;  %v222_v11 = vld [vmem:[%s1512_s12 + $0x10] sm:$0xff]  ;;  %v1050_v12 = vpack.c.bf16 %v221_v10, %v220_v9  ;;  %v223_v13 = vld [vmem:[%s1512_s12 + $0x18] sm:$0xff]  ;;  %v934_v15 = vld [vmem:[%s1511_s11] ss:$0 sm:$0xff]  ;;  %vm231_vm3 = vcmask 261120   ;;  %vm487_vm5 = vcmask 15360  }
  0x10   :  { %1048 = vmatpush3.bf16.msra.mxu1 %v1047_v6  ;;  %1049 = vmatprep.subr.bf16.mxu0 %v1188_v5  ;;  %v1053_v14 = vpack.c.bf16 %v223_v13, %v222_v11  ;;  %v936_v20 = vld [vmem:[%s1513_s13] ss:$0 sm:$0xff]  ;;  %v384_v27 = vshrl.u32 %v383_v26, 7  ;;  %v386_v28 = vand.u32 127, %v383_v26  ;;  %s1526_s23 = sld [smem:[#allocation14_spill]]  ;;  %s1527_s10 = sld [smem:[#allocation15_spill]] }
  0x11   :  { %997 = vmatprep.mubr.msk.f32.mxu0 %vm1187_vm1, %v1186_v2  ;;  %1000 = vmatprep.subr.mxu1 %v1186_v2  ;;  %v1352_v29 = vld [vmem:[%s1504_s4] sm:$0xff]  ;;  %vm622_vm8 = vcmask 1043456   ;;  %vm618_vm9 = vcmask 31744   ;;  %v707_v4 = vld [vmem:[%s1507_s7 + $0x8] sm:$0xff]  ;;  %v713_v13 = vld [vmem:[%s1507_s7 + $0x38] sm:$0xff]  ;;  %vm698_vm10 = vcmask 523264  }
  0x12   :  { %1051 = vmatpush3.bf16.msra.mxu0 %v1050_v12  ;;  %vm387_vm4 = vcmp.eq.s32.totalorder %v384_v27, %v386_v28  ;;  %v1356_v30 = vsub.s32 0, %v384_v27  ;;  %v1361_v31 = vld [vmem:[%s1505_s5] sm:$0x1]  ;;  %v711_v10 = vld [vmem:[%s1507_s7 + $0x28] sm:$0xff]  ;;  %v712_v12 = vld [vmem:[%s1507_s7 + $0x30] sm:$0xff]  ;;  %vm514_vm12 = vcmp.gt.f32.partialorder %v1352_v29, 0.0 }
  0x13   :  { %1052 = vmatprep.subr.bf16.mxu0 %v1188_v5  ;;  %v617_v59 = vld [vmem:[%s1506_s6] sm:$0xf]  ;;  %v790_v26 = vld [vmem:[%s1514_s14 + $0x8] sm:$0xff]  ;;  %vm515_vm11 = vcmp.lt.f32.partialorder %v1361_v31, 0.5  ;;  %vm865_vm14 = vcmask 24576   ;;  %s1191_s27 = smov [#allocation2]  }
  0x14   :  { %v495_v32 = vrot.slane %v1361_v31, %v1356_v30  ;;  %v706_v3 = vld [vmem:[%s1507_s7] sm:$0xff]  ;;  %s884_s28 = sshll.u32 %s1191_s27, 4  ;;  %s885_s28 = int_to_ptr.vmem [resolvable:$true] %s884_s28 }
  0x15   :  { %v1056_v6 = vpack.c.bf16 %v707_v4, %v706_v3  ;;  %v710_v9 = vld [vmem:[%s1507_s7 + $0x20] sm:$0xff] }
  0x16   :  { %1054 = vmatpush3.bf16.msra.mxu0 %v1053_v14  ;;  %v497_v33 = vmul.f32 %v495_v32, %v1352_v29  ;;  %v408_v54 = vld [vmem:[%s1526_s23] sm:$0xff]  ;;  %v1062_v11 = vpack.c.bf16 %v711_v10, %v710_v9  ;;  %v1065_v14 = vpack.c.bf16 %v713_v13, %v712_v12 }
  0x17   :  { %1055 = vmatprep.subr.bf16.mxu0 %v1188_v5  ;;  %v543_v56 = vld [vmem:[%s1527_s10] sm:$0xff] }
  0x18   :  { %v498_v34 = vsel %vm487_vm5, %v497_v33, 0.0  ;;  %v714_v28 = vld [vmem:[%s1509_s9] sm:$0x1] }
  0x19   :  { %499 = vadd.xlane.f32.xlu1 %v498_v34 }
  0xe2   :  { %v132_v7 = vpop.f32.mrb[0].mxu0 }
  0xe3   :  { %v981_v8 = vpop.f32.mrb[1].mxu0  ;;  %987 = vmatmul.mubr.msk.f32.vlgmr.msra.gmra.mrb[0].mxu1 %vm145_vm2, %v132_v7  ;;  %v708_v7 = vld [vmem:[%s1507_s7 + $0x10] sm:$0xff] }
  0xe4   :  { %1002 = vmatprep.mubr.msk.f32.mxu1 %vm1187_vm1, %v1186_v2 }
 0x1b6   :  { %v215_v16 = vpop.f32.mrb[0].mxu1 }
 0x1b7   :  { %v216_v17 = vadd.f32 %v934_v15, %v215_v16  ;;  %v988_v18 = vpop.f32.mrb[1].mxu1  ;;  %v696_v15 = vld [vmem:[%s1508_s8] sm:$0xff] }
 0x1b9   :  { %1078 = vtanh.f32 %v216_v17 }
 0x1c3   :  { %v1079_v19 = vpop.eup %1078 }
 0x1c4   :  { %998 = vmatmul.mubr.msk.f32.vlgmr.msra.gmra.mrb[2].mxu0 %vm231_vm3, %v1079_v19 }
 0x1c5   :  { %1036 = vmatprep.mubr.msk.f32.mxu0 %vm1187_vm1, %v1186_v2  ;;  %1057 = vmatpush3.bf16.msra.mxu0 %v1056_v6 }
 0x1c6   :  { %1058 = vmatprep.subr.bf16.mxu0 %v1188_v5 }
 0x297   :  { %v301_v21 = vpop.f32.mrb[2].mxu0 }
 0x298   :  { %v302_v22 = vadd.f32 %v936_v20, %v301_v21  ;;  %v999_v23 = vpop.f32.mrb[3].mxu0 }
 0x29a   :  { %305 = vst.msk [vmem:[#allocation2] sm:$0xff] %vm62_vm0, %v302_v22  ;;  %1001 = vmatpush3.xpose.msk.msra.mxu1 %vm62_vm0, %v302_v22  ;;  %v379_v24 = vmul.f32 %v302_v22, %v302_v22 }
 0x29b   :  { %1005 = vmatprep.subr.mxu1 %v1186_v2 }
 0x29c   :  { %v380_v25 = vsel %vm62_vm0, %v379_v24, 0.0 }
 0x29d   :  { %381 = vadd.xlane.f32.xlu0 %v380_v25  ;;  %1003 = vmatmul.mubr.msk.f32.vlgmr.msra.gmra.mrb[2].mxu1 %vm62_vm0, %v302_v22  ;;  %v789_v25 = vld [vmem:[%s1514_s14] sm:$0xff] }
 0x29e   :  { %1007 = vmatprep.mubr.msk.f32.mxu1 %vm1187_vm1, %v1186_v2  ;;  %1006 = vmatpush3.msra.mxu1 %v1352_v29  ;;  %v1068_v27 = vpack.c.bf16 %v790_v26, %v789_v25 }
 0x29f   :  { %1010 = vmatprep.subr.mxu1 %v1186_v2 }
 0x32a   :  { %v382_v45 = vpop.xlane.xlu0 %381 }
 0x370   :  { %v375_v35 = vpop.f32.mrb[2].mxu1 }
 0x371   :  { %v388_v36 = vsel %vm387_vm4, %v375_v35, 0.0  ;;  %v1004_v37 = vpop.f32.mrb[3].mxu1  ;;  %v397_v47 = vmul.f32 2.0, %v375_v35 }
 0x372   :  { %v389_v38 = vsel %vm62_vm0, %v388_v36, 0.0  ;;  %v505_v36 = vmax.f32 %v1361_v31, 1.0 }
 0x373   :  { %v390_v39 = vrot.slane %v389_v38, 4 }
 0x374   :  { %v510_v37 = vrot.slane %v505_v36, %v1356_v30 }
 0x375   :  { %v391_v40 = vadd.f32 %v390_v39, %v389_v38  ;;  %v1189_v38 = vmov 0  }
 0x376   :  { %v516_v39 = vsel %vm515_vm11, 1, %v1189_v38 }
 0x377   :  { %v392_v41 = vrot.slane %v391_v40, 2 }
 0x379   :  { %v393_v42 = vadd.f32 %v392_v41, %v391_v40  ;;  %v520_v40 = vrot.slane %v516_v39, %v1356_v30 }
 0x37b   :  { %v394_v43 = vrot.slane %v393_v42, 1  ;;  %vm521_vm13 = vcmp.eq.s32.totalorder %v520_v40, 1 }
 0x37c   :  { %vm522_vm15 = vmor %vm514_vm12, %vm521_vm13 }
 0x37d   :  { %v395_v44 = vadd.f32 %v394_v43, %v393_v42  ;;  %v791_v42 = vld [vmem:[%s1515_s15] sm:$0x1]  ;;  %s1190_s15 = smov [#allocation4]  }
 0x37e   :  { %s894_s6 = sshll.u32 %s1190_s15, 4  ;;  %s895_s6 = int_to_ptr.vmem [resolvable:$true] %s894_s6 }
 0x37f   :  { %v396_v46 = vadd.f32 %v395_v44, %v382_v45  ;;  %s1092_s29 = scalar_lea.vmem %s895_s6, 128  ;;  %p1097_p1 = scmp.lt.s32.totalorder %s895_s6, %s895_s6 }
 0x380   :  { %p1093_p0 = scmp.ne.s32.totalorder %s895_s6, %s1092_s29  ;;  %p1098_p2 = scmp.lt.s32.totalorder %s1092_s29, %s1092_s29 }
 0x381   :  { %v398_v48 = vsub.f32 %v396_v46, %v397_v47 }
 0x382   :  { %p1099_p3 = por %p1098_p2, %p1097_p1 }
 0x383   :  { %v399_v49 = vmax.f32 %v398_v48, 0.0  ;;  %v500_v48 = vpop.xlane.xlu1 %499 }
 0x384   :  { %p1100_p4 = pnand %p1099_p3, %p1093_p0 }
 0x385   :  { %1080 = vrsqrt.f32 %v399_v49  ;;  %vm402_vm6 = vcmp.eq.f32.partialorder %v399_v49, inf  ;;  %v405_v52 = vand.u32 2147483648, %v399_v49  ;;  %vm404_vm7 = vcmp.eq.f32.partialorder %v399_v49, 0.0 }
 0x386   :  { %1082 = vrcp.f32 %v510_v37 }
 0x38f   :  { %v1081_v50 = vpop.eup %1080 }
 0x390   :  { %v401_v51 = vmul.f32 %v1081_v50, %v399_v49  ;;  %v1083_v41 = vpop.eup %1082 }
 0x392   :  { %v403_v53 = vsel %vm402_vm6, %v399_v49, %v401_v51  ;;  %v941_v49 = vadd.f32 -1.0, %v500_v48 }
 0x393   :  { %v406_v55 = vsel %vm404_vm7, %v405_v52, %v403_v53 }
 0x394   :  { %v407_v57 = vsel %vm387_vm4, 0.0, %v406_v55  ;;  %v502_v50 = vmax.f32 %v941_v49, 1.0 }
 0x395   :  { %v409_v58 = vmul.f32 %v408_v54, %v407_v57  ;;  %1008 = vmatmul.mubr.msk.f32.vlgmr.msra.gmra.mrb[4].mxu1 %vm62_vm0, %v407_v57 }
 0x396   :  { %1011 = vmatpush3.msra.mxu1 %v543_v56  ;;  %1012 = vmatprep.mubr.msk.f32.mxu1 %vm1187_vm1, %v1186_v2  ;;  %1084 = vrcp.f32 %v502_v50 }
 0x397   :  { %410 = vst.msk [vmem:[#allocation4] sm:$0xff] %vm62_vm0, %v409_v58  ;;  %1015 = vmatprep.subr.mxu1 %v1186_v2 }
 0x399   :  { %1013 = vmatmul.mubr.msk.f32.vlgmr.msra.gmra.mrb[6].mxu1 %vm62_vm0, %v409_v58  ;;  %vm532_vm0 = vcmp.gt.f32.partialorder %v500_v48, 1.0 }
 0x39a   :  { %1017 = vmatprep.mubr.msk.f32.mxu1 %vm1187_vm1, %v1186_v2  ;;  %1016 = vmatpush3.msk.msra.mxu1 %vm622_vm8, %v617_v59 }
 0x39b   :  { %1067 = vmatprep.subr.bf16.mxu1 %v1188_v5 }
 0x468   :  { %v1388_v60 = vpop.f32.mrb[4].mxu1 }
 0x469   :  { %v486_v61 = vmul.f32 %v1388_v60, %v1352_v29  ;;  %v1009_v62 = vpop.f32.mrb[5].mxu1  ;;  %v513_v43 = vmul.f32 %v1083_v41, %v1388_v60  ;;  %v1085_v29 = vpop.eup %1084 }
 0x46b   :  { %v488_v63 = vsel %vm487_vm5, %v486_v61, 0.0  ;;  %v523_v47 = vsel %vm522_vm15, 1e+30, %v513_v43 }
 0x46c   :  { %489 = vadd.xlane.f32.xlu1 %v488_v63  ;;  %v613_v0 = vpop.f32.mrb[6].mxu1  ;;  %v524_v30 = vsel %vm487_vm5, %v523_v47, inf }
 0x46d   :  { %v1014_v1 = vpop.f32.mrb[7].mxu1  ;;  %1018 = vmatmul.mubr.msk.f32.vlgmr.msra.gmra.mrb[8].mxu1 %vm618_vm9, %v613_v0 }
 0x46e   :  { %1043 = vmatprep.mubr.msk.f32.mxu1 %vm1187_vm1, %v1186_v2  ;;  %v709_v2 = vld [vmem:[%s1507_s7 + $0x18] sm:$0xff]  ;;  %1069 = vmatpush3.bf16.msra.mxu1 %v1068_v27 }
 0x46f   :  { %v1059_v8 = vpack.c.bf16 %v709_v2, %v708_v7 }
 0x471   :  { %1060 = vmatpush3.bf16.msra.mxu0 %v1059_v8 }
 0x472   :  { %1061 = vmatprep.subr.bf16.mxu0 %v1188_v5 }
 0x475   :  { %1063 = vmatpush3.bf16.msra.mxu0 %v1062_v11 }
 0x476   :  { %1064 = vmatprep.subr.bf16.mxu0 %v1188_v5 }
 0x479   :  { %1066 = vmatpush3.bf16.msra.mxu0 %v1065_v14 }
 0x4f9   :  { %v490_v51 = vpop.xlane.xlu1 %489 }
 0x4fa   :  { %v504_v54 = vmul.f32 %v1085_v29, %v490_v51 }
 0x540   :  { %v692_v16 = vpop.f32.mrb[8].mxu1 }
 0x541   :  { %v697_v17 = vmul.f32 %v696_v15, %v692_v16  ;;  %v1019_v18 = vpop.f32.mrb[9].mxu1 }
 0x543   :  { %v699_v19 = vsel %vm698_vm10, %v697_v17, 0.0 }
 0x544   :  { %v700_v5 = vrot.slane %v699_v19, 4 }
 0x546   :  { %v701_v20 = vadd.f32 %v700_v5, %v699_v19 }
 0x548   :  { %v702_v21 = vrot.slane %v701_v20, 2 }
 0x54a   :  { %v703_v22 = vadd.f32 %v702_v21, %v701_v20 }
 0x54c   :  { %v704_v23 = vrot.slane %v703_v22, 1 }
 0x54e   :  { %v705_v24 = vadd.f32 %v704_v23, %v703_v22 }
 0x550   :  { %1037 = vmatmul.mubr.msk.f32.vlgmr.msra.gmra.mrb[4].mxu0 %vm698_vm10, %v705_v24 }
 0x623   :  { %v784_v32 = vpop.f32.mrb[4].mxu0 }
 0x624   :  { %v785_v33 = vadd.f32 %v784_v32, %v714_v28  ;;  %v1038_v34 = vpop.f32.mrb[5].mxu0 }
 0x626   :  { %v788_v35 = vmax.f32 %v785_v33, 0.0 }
 0x628   :  { %1044 = vmatmul.mubr.msk.f32.vlgmr.msra.gmra.mrb[10].mxu1 %vm145_vm2, %v788_v35 }
 0x6fb   :  { %v861_v44 = vpop.f32.mrb[10].mxu1 }
 0x6fc   :  { %v862_v45 = vadd.f32 %v861_v44, %v791_v42  ;;  %v1045_v46 = vpop.f32.mrb[11].mxu1 }
 0x6fe   :  { %v866_v31 = vsel %vm865_vm14, %v862_v45, -inf }
 0x6ff   :  { %867 = vmax.xlane.f32.xlu0 %v866_v31 }
 0x703   :  { %525 = vmin.xlane.f32.xlu0 %v524_v30 }
 0x78c   :  { %v868_v52 = vpop.xlane.xlu0 %867 }
 0x78d   :  { %v869_v53 = vsub.f32 %v862_v45, %v868_v52 }
 0x78f   :  { %v870_v55 = vmul.f32 1.442695, %v869_v53 }
 0x790   :  { %v526_v56 = vpop.xlane.xlu0 %525 }
 0x791   :  { %1086 = vpow2.f32 %v870_v55  ;;  %v528_v57 = vmax.f32 %v504_v54, %v526_v56  ;;  %v527_v61 = vsub.f32 %v526_v56, %v504_v54 }
 0x793   :  { %v529_v58 = vmax.f32 %v528_v57, 1e-12 }
 0x795   :  { %1088 = vrcp.f32 %v529_v58 }
 0x79b   :  { %v1446_v59 = vpop.eup %1086 }
 0x79c   :  { %v872_v60 = vsel %vm865_vm14, %v1446_v59, 0.0 }
 0x79d   :  { %873 = vadd.xlane.f32.xlu1 %v872_v60 }
 0x79f   :  { %v1089_v62 = vpop.eup %1088 }
 0x7a0   :  { %v531_v63 = vmul.f32 %v1089_v62, %v527_v61 }
 0x7a2   :  { %v533_v0 = vsel %vm532_vm0, %v531_v63, 0.0 }
 0x7a3   :  { %v534_v1 = vrot.slane %v533_v0, 4 }
 0x7a5   :  { %v535_v3 = vadd.f32 %v534_v1, %v533_v0 }
 0x7a7   :  { %v536_v4 = vrot.slane %v535_v3, 2 }
 0x7a9   :  { %v537_v6 = vadd.f32 %v536_v4, %v535_v3 }
 0x7ab   :  { %v538_v7 = vrot.slane %v537_v6, 1 }
 0x7ad   :  { %v539_v2 = vadd.f32 %v538_v7, %v537_v6 }
 0x7ae   :  { %1103 = shalt.err (!%p1100_p4)
}
 0x7af   :  { %s1104_s20 = scalar_lea.hbm %s1517_s17, 128 }
 0x7b0   :  { %p1105_p5 = scmp.ne.s32.totalorder %s1517_s17, %s1104_s20  ;;  %p1108_p6 = scmp.lt.u32.totalorder %s1104_s20, %s1517_s17 }
 0x7b2   :  { %p1110_p7 = pnand %p1108_p6, %p1105_p5 }
 0x7b4   :  { %1113 = shalt.err (!%p1110_p7)
}
 0x7b5   :  { %897 = dma.vmem_to_hbm [thread:$0]  %s895_s6, 128, %s1517_s17, [#allocation5]   ;;  %vm541_vm1 = vcmask 0  }
 0x7b6   :  { %s1114_s2 = scalar_lea.vmem %s885_s28, 128  ;;  %p1119_p9 = scmp.lt.s32.totalorder %s885_s28, %s885_s28 }
 0x7b7   :  { %p1115_p8 = scmp.ne.s32.totalorder %s885_s28, %s1114_s2  ;;  %p1120_p10 = scmp.lt.s32.totalorder %s1114_s2, %s1114_s2 }
 0x7b9   :  { %p1121_p11 = por %p1120_p10, %p1119_p9 }
 0x7bb   :  { %p1122_p12 = pnand %p1121_p11, %p1115_p8 }
 0x7bd   :  { %1125 = shalt.err (!%p1122_p12)
}
 0x7be   :  { %s1126_s23 = scalar_lea.hbm %s1516_s16, 128 }
 0x7bf   :  { %p1127_p13 = scmp.ne.s32.totalorder %s1516_s16, %s1126_s23  ;;  %p1130_p0 = scmp.lt.u32.totalorder %s1126_s23, %s1516_s16 }
 0x7c1   :  { %p1132_p1 = pnand %p1130_p0, %p1127_p13 }
 0x7c3   :  { %1135 = shalt.err (!%p1132_p1)
}
 0x7c4   :  { %887 = dma.vmem_to_hbm [thread:$0]  %s885_s28, 128, %s1516_s16, [#allocation3]   ;;  %v540_v8 = vmul.f32 0.125, %v539_v2 }
 0x7c5   :  { %s1192_s8 = smov [#allocation7]  }
 0x7c6   :  { %542 = vst.msk [vmem:[#allocation7] sm:$0x1] %vm541_vm1, %v540_v8  ;;  %s914_s26 = sshll.u32 %s1192_s8, 4  ;;  %s915_s26 = int_to_ptr.vmem [resolvable:$true] %s914_s26 }
 0x7c7   :  { %s1136_s14 = scalar_lea.vmem %s915_s26, 16  ;;  %s1140_s9 = scalar_lea.vmem %s915_s26, 32 }
 0x7c8   :  { %p1137_p2 = scmp.ne.s32.totalorder %s915_s26, %s1136_s14  ;;  %p1141_p3 = scmp.lt.s32.totalorder %s915_s26, %s915_s26 }
 0x7c9   :  { %p1142_p4 = scmp.lt.s32.totalorder %s1140_s9, %s1136_s14 }
 0x7cb   :  { %p1143_p5 = por %p1142_p4, %p1141_p3 }
 0x7cd   :  { %p1144_p6 = pnand %p1143_p5, %p1137_p2 }
 0x7cf   :  { %1147 = shalt.err (!%p1144_p6)
}
 0x7d0   :  { %s1148_s27 = scalar_lea.hbm %s1519_s19, 16 }
 0x7d1   :  { %p1149_p7 = scmp.ne.s32.totalorder %s1519_s19, %s1148_s27  ;;  %p1152_p8 = scmp.lt.u32.totalorder %s1148_s27, %s1519_s19 }
 0x7d3   :  { %p1154_p9 = pnand %p1152_p8, %p1149_p7 }
 0x7d5   :  { %1157 = shalt.err (!%p1154_p9)
}
 0x7d6   :  { %917 = dma.vmem_to_hbm [thread:$0]  %s915_s26, 16, %s1519_s19, [#allocation8]  }
 0x7d7   :  { %s1193_s21 = smov [#allocation6]  }
 0x7d8   :  { %s904_s12 = sshll.u32 %s1193_s21, 4  ;;  %s905_s12 = int_to_ptr.vmem [resolvable:$true] %s904_s12 }
 0x7d9   :  { %s1158_s1 = scalar_lea.vmem %s905_s12, 16  ;;  %s1162_s11 = scalar_lea.vmem %s905_s12, 32 }
 0x7da   :  { %p1159_p10 = scmp.ne.s32.totalorder %s905_s12, %s1158_s1  ;;  %p1163_p11 = scmp.lt.s32.totalorder %s905_s12, %s905_s12 }
 0x7db   :  { %p1164_p12 = scmp.lt.s32.totalorder %s1162_s11, %s1158_s1 }
 0x7dd   :  { %p1165_p13 = por %p1164_p12, %p1163_p11 }
 0x7df   :  { %p1166_p0 = pnand %p1165_p13, %p1159_p10 }
 0x82a   :  { %v874_v9 = vpop.xlane.xlu1 %873 }
 0x82b   :  { %1090 = vrcp.f32 %v874_v9 }
 0x835   :  { %v1091_v10 = vpop.eup %1090 }
 0x836   :  { %v876_v11 = vmul.f32 %v1091_v10, %v1446_v59 }
 0x838   :  { %877 = vst.msk [vmem:[#allocation6] sm:$0x1] %vm865_vm14, %v876_v11 }
 0x839   :  { %1169 = shalt.err (!%p1166_p0)
}
 0x83a   :  { %s1170_s22 = scalar_lea.hbm %s1518_s18, 16 }
 0x83b   :  { %p1171_p1 = scmp.ne.s32.totalorder %s1518_s18, %s1170_s22  ;;  %p1174_p2 = scmp.lt.u32.totalorder %s1170_s22, %s1518_s18 }
 0x83d   :  { %p1176_p3 = pnand %p1174_p2, %p1171_p1 }
 0x83f   :  { %1179 = shalt.err (!%p1176_p3)
}
 0x840   :  { %907 = dma.vmem_to_hbm [thread:$0]  %s905_s12, 16, %s1518_s18, [#allocation5]  }
 0x841   :  { %1180 = dma.done.wait [#allocation3], 128  }
 0x842   :  { %1181 = vsyncadd [#allocation3], 4294967168 }
 0x843   :  { %1182 = dma.done.wait [#allocation5], 144  }
 0x844   :  { %1183 = vsyncadd [#allocation5], 4294967152 }
 0x845   :  { %1184 = dma.done.wait [#allocation8], 16  }
 0x846   :  { %1185 = vsyncadd [#allocation8], 4294967280 }
 0x847   :  { %930 = vsyncpa [#allocation3], 1 }
 0x848   :  { %931 = vsyncpa [#allocation5], 1 }
 0x849   :  { %932 = vsyncpa [#allocation8], 1 }

</bundles_post_ra>
